<compile_context>
chip_gen: v5e
topology: v5e:2x2
jax: 0.10.0
libtpu: 0.0.40
codegen_flags: <defaults>
</compile_context>

<pallas_src>
import math

import jax
import jax.numpy as jnp
from jax.experimental import pallas as pl
from jax.experimental.pallas import tpu as pltpu


# ----------------------------- kernels --------------------------------------

def _add_kernel(a_ref, b_ref, o_ref):
    o_ref[...] = (a_ref[...] + b_ref[...]).astype(o_ref.dtype)


def _gated_add_kernel(gate_ref, a_ref, b_ref, o_ref):
    # Compute in f32 so an f32 gate with lower-precision activations matches
    # PyTorch type promotion; the op is HBM-bound so the upcast is free filler.
    a = a_ref[...].astype(jnp.float32)
    b = b_ref[...].astype(jnp.float32)
    g = gate_ref[...].astype(jnp.float32)        # (1, td) broadcasts over rows
    o_ref[...] = (a + g * b).astype(o_ref.dtype)


def _concat_kernel(a_ref, b_ref, o_ref):
    d = a_ref.shape[-1]            # static; lane aligned (only used if D%128==0)
    o_ref[:, :d] = a_ref[...]
    o_ref[:, d:] = b_ref[...]


# ----------------------------- tiling helpers --------------------------------

_MIN_SUBLANES = {1: 32, 2: 16, 4: 8}     # itemsize -> native sublane packing
_TARGET_BLOCK_BYTES = 2 << 20            # ~2 MiB per pipelined array per step
_MIN_SPLIT_BLOCK_BYTES = 1 << 20         # don't split below ~1 MiB/array (v7x)


def _round_up(x, m):
    return ((x + m - 1) // m) * m


def _tpu_generation():
    try:
        kind = jax.devices()[0].device_kind.lower()
    except Exception:
        return ""
    for g in ("v7", "v6", "v5"):
        if g in kind:
            return g
    return ""


def _vmem_budget(gen):
    # Double-buffered working-set budgets that fit each generation's default
    # scoped-VMEM limit: v5e 16 MiB scoped, v6e 32 MiB, v7x 32 MiB (64 phys).
    if gen in ("v6", "v7"):
        return 24 << 20
    return 12 << 20


def _choose_rows(rows, sub, array_row_bytes, total_row_bytes, gen):
    """Rows per block, sized by bytes (not a fixed row count)."""
    budget = _vmem_budget(gen)
    cap = max(sub, (budget // (2 * total_row_bytes)) // sub * sub)
    tgt = max(sub, (_TARGET_BLOCK_BYTES // array_row_bytes) // sub * sub)
    tb = min(cap, tgt)
    if tb >= rows:
        tb = rows                         # single full-extent block (legal)
        if gen == "v7":
            # 2 TensorCores: split only if each block keeps >= ~1 MiB / array,
            # preferring >=2 steps per core so output writeback stays hidden.
            min_rows = max(sub, _round_up(
                max(1, _MIN_SPLIT_BLOCK_BYTES // array_row_bytes), sub))
            for steps in (4, 2):
                split = _round_up(pl.cdiv(rows, steps), sub)
                if split < rows and split >= min_rows:
                    tb = min(split, cap)
                    break
    return tb


def _choose_feature_tile(rows, width, sub, bytes_per_col, gen):
    """Lane-aligned feature tile. Shrinks the feature tile (instead of the row
    tile) only when full-width blocks would force row tiles below ~256 rows
    within the VMEM budget. bytes_per_col = sum of itemsizes over arrays."""
    if width % 128 != 0:
        return width                      # full-extent block (fallback path)
    budget = _vmem_budget(gen)
    want_rows = min(256, _round_up(rows, sub))
    td = width
    for cand in range(width, 0, -128):
        if width % cand != 0:
            continue
        td = cand
        cap = (budget // (2 * cand * bytes_per_col)) // sub * sub
        if cap >= want_rows:
            break
    return td


def _lane_dense_view(B, D):
    """For 'add': reshape B*D elements to (rows, width) with a lane-aligned
    width when D itself is not a multiple of 128 (pure layout plumbing)."""
    if D % 128 == 0:
        return None
    total = B * D
    for width in (2048, 1024, 512, 256, 128):
        if total % width == 0:
            return total // width, width
    return None


def _gated_lane_dense_factor(B, D, max_width=4096):
    """For 'gated_add': find m with (B, D) -> (B/m, m*D), m*D % 128 == 0.
    The gate pattern then repeats exactly m times per reshaped row."""
    if D % 128 == 0:
        return 1
    m0 = 128 // math.gcd(D, 128)
    m = m0
    while m * D <= max_width:
        if B % m == 0:
            return m
        m += m0
    return None    # fall back to masked stores on the feature dim


# ----------------------------- launch helper ---------------------------------

def _launch_elementwise(kernel, arrays, gate, rows, width, out_dtype, gen):
    """Launch an elementwise kernel over a (rows, width) slab.
    arrays: list of (rows, width) inputs; gate: optional (1, width) operand."""
    itemsizes = [jnp.dtype(a.dtype).itemsize for a in arrays]
    itemsizes.append(jnp.dtype(out_dtype).itemsize)
    sub = _MIN_SUBLANES.get(min(itemsizes), 8)
    bytes_per_col = sum(itemsizes)

    td = _choose_feature_tile(rows, width, sub, bytes_per_col, gen)
    tb = _choose_rows(rows, sub,
                      array_row_bytes=td * max(itemsizes),
                      total_row_bytes=td * bytes_per_col, gen=gen)

    if td == width:
        grid = (pl.cdiv(rows, tb),)
        io_spec = pl.BlockSpec((tb, td), lambda i: (i, 0))
        gate_spec = pl.BlockSpec((1, td), lambda i: (0, 0))   # resident
        sem = ("parallel",)
    else:
        grid = (pl.cdiv(rows, tb), width // td)
        io_spec = pl.BlockSpec((tb, td), lambda i, j: (i, j))
        gate_spec = pl.BlockSpec((1, td), lambda i, j: (0, j))
        sem = ("parallel", "parallel")

    in_specs = ([gate_spec] if gate is not None else []) + [io_spec] * len(arrays)
    operands = ([gate] if gate is not None else []) + list(arrays)

    return pl.pallas_call(
        kernel,
        out_shape=jax.ShapeDtypeStruct((rows, width), out_dtype),
        grid_spec=pltpu.PrefetchScalarGridSpec(
            num_scalar_prefetch=0, grid=grid,
            in_specs=in_specs, out_specs=io_spec),
        compiler_params=pltpu.CompilerParams(dimension_semantics=sem),
    )(*operands)


# ----------------------------- wrapper ---------------------------------------

def combine_noise(latent_in, ladder_in, gate_var, combine_type):
    """JAX/Pallas equivalent of CombineNoise.forward.

    latent_in, ladder_in : (B, D) arrays.
    gate_var             : (1, D) array (only used for 'gated_add').
    combine_type         : 'concat' | 'add' | 'gated_add'.
    """
    B, D = latent_in.shape
    assert ladder_in.shape == (B, D)
    gen = _tpu_generation()

    if combine_type == 'add':
        out_dtype = jnp.result_type(latent_in.dtype, ladder_in.dtype)
        view = _lane_dense_view(B, D)
        if view is not None:
            rows, width = view
            a = latent_in.reshape(rows, width)
            b = ladder_in.reshape(rows, width)
        else:
            rows, width = B, D
            a, b = latent_in, ladder_in
        out = _launch_elementwise(_add_kernel, [a, b], None,
                                  rows, width, out_dtype, gen)
        return out.reshape(B, D)

    elif combine_type == 'gated_add':
        assert gate_var.shape == (1, D)
        out_dtype = jnp.result_type(latent_in.dtype, ladder_in.dtype,
                                    gate_var.dtype)
        m = _gated_lane_dense_factor(B, D)
        if m is not None and m > 1:
            # Lane-dense view: gate repeats exactly m times per reshaped row.
            rows, width = B // m, m * D
            a = latent_in.reshape(rows, width)
            b = ladder_in.reshape(rows, width)
            g = jnp.tile(gate_var, (1, m))
        else:
            # D % 128 == 0 (already lane aligned) or no valid reshape factor;
            # the latter uses masked stores but stays correct.
            rows, width = B, D
            a, b, g = latent_in, ladder_in, gate_var
        out = _launch_elementwise(_gated_add_kernel, [a, b], g,
                                  rows, width, out_dtype, gen)
        return out.reshape(B, D)

    elif combine_type == 'concat':
        assert latent_in.dtype == ladder_in.dtype
        dtype = latent_in.dtype
        if D % 128 != 0:
            # Non-lane-aligned halves would force masked partial stores; XLA's
            # concatenate runs this pure copy at HBM roofline instead (per the
            # perf review the Pallas path is at best parity with XLA concat).
            return jnp.concatenate([latent_in, ladder_in], axis=-1)
        itemsize = jnp.dtype(dtype).itemsize
        sub = _MIN_SUBLANES.get(itemsize, 8)
        # 2 input rows of D + 1 output row of 2D pipelined per batch row.
        tb = _choose_rows(B, sub,
                          array_row_bytes=D * itemsize,
                          total_row_bytes=4 * D * itemsize, gen=gen)
        in_spec = pl.BlockSpec((tb, D), lambda i: (i, 0))
        out_spec = pl.BlockSpec((tb, 2 * D), lambda i: (i, 0))
        return pl.pallas_call(
            _concat_kernel,
            out_shape=jax.ShapeDtypeStruct((B, 2 * D), dtype),
            grid_spec=pltpu.PrefetchScalarGridSpec(
                num_scalar_prefetch=0, grid=(pl.cdiv(B, tb),),
                in_specs=[in_spec, in_spec], out_specs=out_spec),
            compiler_params=pltpu.CompilerParams(
                dimension_semantics=("parallel",)),
        )(latent_in, ladder_in)

    else:
        raise ValueError('Wrong method name used for CombineNoise Class')


# ----------------------------- demo ------------------------------------------

if __name__ == "__main__":
    key = jax.random.PRNGKey(0)
    k_lat, k_lad, k_gate, k_lat2, k_lad2, k_gate2 = jax.random.split(key, 6)

    batch, dim = 32, 256   # small, TPU-friendly
    latent = jax.random.normal(k_lat, (batch, dim), dtype=jnp.float32)
    ladder = jax.random.normal(k_lad, (batch, dim), dtype=jnp.float32)
    # Deterministic stand-in for torch.randn(1, dim_size) gate_var.
    gate = jax.random.normal(k_gate, (1, dim), dtype=jnp.float32)

    # add
    out_add = jax.block_until_ready(combine_noise(latent, ladder, gate, 'add'))
    assert jnp.allclose(out_add, latent + ladder, atol=1e-6)

    # gated_add (broadcasts (1, D) gate over the batch)
    out_gated = jax.block_until_ready(
        combine_noise(latent, ladder, gate, 'gated_add'))
    assert jnp.allclose(out_gated, latent + gate * ladder, atol=1e-6)

    # concat (along last dim, matching torch.cat(..., dim=-1))
    out_cat = jax.block_until_ready(
        combine_noise(latent, ladder, gate, 'concat'))
    assert out_cat.shape == (batch, 2 * dim)
    assert jnp.allclose(out_cat, jnp.concatenate([latent, ladder], axis=-1),
                        atol=1e-6)

    # add / gated_add with a non-128-multiple feature dim -> lane-dense paths
    dim2 = 192
    latent2 = jax.random.normal(k_lat2, (batch, dim2), dtype=jnp.float32)
    ladder2 = jax.random.normal(k_lad2, (batch, dim2), dtype=jnp.float32)
    gate2 = jax.random.normal(k_gate2, (1, dim2), dtype=jnp.float32)

    out_add2 = jax.block_until_ready(
        combine_noise(latent2, ladder2, None, 'add'))
    assert jnp.allclose(out_add2, latent2 + ladder2, atol=1e-6)

    out_gated2 = jax.block_until_ready(
        combine_noise(latent2, ladder2, gate2, 'gated_add'))
    assert jnp.allclose(out_gated2, latent2 + gate2 * ladder2, atol=1e-6)

    print("KERNEL_OK")
</pallas_src>

<mosaic_0001>
module attributes {stable_mosaic.version = 11 : i64} {
  func.func @_add_kernel(%arg0: i32, %arg1: memref<32x256xf32, #tpu.memory_space<vmem>>, %arg2: memref<32x256xf32, #tpu.memory_space<vmem>>, %arg3: memref<32x256xf32, #tpu.memory_space<vmem>>) attributes {dimension_semantics = [#tpu.dimension_semantics<parallel>], iteration_bounds = array<i64: 1>, scalar_prefetch = 0 : i64, scratch_operands = 0 : i64, tpu.core_type = #tpu.core_type<tc>, window_params = [{transform_indices = @transform_0, window_bounds = array<i64: 32, 256>}, {transform_indices = @transform_1, window_bounds = array<i64: 32, 256>}, {transform_indices = @transform_2, window_bounds = array<i64: 32, 256>}]} {
    %c0 = arith.constant 0 : index
    %c0_0 = arith.constant 0 : index
    %0 = vector.load %arg1[%c0, %c0_0] : memref<32x256xf32, #tpu.memory_space<vmem>>, vector<32x256xf32>
    %c0_1 = arith.constant 0 : index
    %c0_2 = arith.constant 0 : index
    %1 = vector.load %arg2[%c0_1, %c0_2] : memref<32x256xf32, #tpu.memory_space<vmem>>, vector<32x256xf32>
    %2 = arith.addf %0, %1 : vector<32x256xf32>
    %c0_3 = arith.constant 0 : index
    %c0_4 = arith.constant 0 : index
    %3 = vector.load %arg3[%c0_3, %c0_4] : memref<32x256xf32, #tpu.memory_space<vmem>>, vector<32x256xf32>
    tpu.vector_store %arg3[%c0_3, %c0_4], %2 {strides = array<i32>} : memref<32x256xf32, #tpu.memory_space<vmem>>, vector<32x256xf32>,
    return
  }
  func.func @transform_0(%arg0: i32) -> (i32, i32) {
    %c0_i32 = arith.constant 0 : i32
    %c0_i32_0 = arith.constant 0 : i32
    return %arg0, %c0_i32 : i32, i32
  }
  func.func @transform_1(%arg0: i32) -> (i32, i32) {
    %c0_i32 = arith.constant 0 : i32
    %c0_i32_0 = arith.constant 0 : i32
    return %arg0, %c0_i32 : i32, i32
  }
  func.func @transform_2(%arg0: i32) -> (i32, i32) {
    %c0_i32 = arith.constant 0 : i32
    %c0_i32_0 = arith.constant 0 : i32
    return %arg0, %c0_i32 : i32, i32
  }
}

</mosaic_0001>

<bundles_post_ra>
// kernel: tpu_custom_call.1
= control target key start
LH: loop header
LB: loop body
LE: loop exit
PB: predicated region body
PF: predicated region fallthrough
CT: control target
= control target key end

     0   :  { %7 = vsyncpa [#allocation3], 0  ;;  %s217_s0 = inlined_call_operand.hbm [shape: f32[32,256], index: 0, kind: input, shape index: {}]   ;;  %s218_s1 = inlined_call_operand.hbm [shape: f32[32,256], index: 1, kind: input, shape index: {}]   ;;  %s219_s2 = inlined_call_operand.hbm [shape: f32[32,256], index: 2, kind: output, shape index: {}]  }
   0x1   :  { %8 = vsyncpa [#allocation6], 0 }
   0x2   :  { %9 = vsyncpa [#allocation4], 0  ;;  %s14_s11 = sshll.u32 %s217_s0, 4  ;;  %s179_s12 = smov [#allocation2]   ;;  %s15_s11 = int_to_ptr.hbm [resolvable:$true] %s14_s11 }
   0x3   :  { %s16_s13 = sshll.u32 %s179_s12, 4  ;;  %s27_s16 = sshll.u32 %s218_s1, 4  ;;  %s17_s13 = int_to_ptr.vmem [resolvable:$true] %s16_s13  ;;  %s28_s16 = int_to_ptr.hbm [resolvable:$true] %s27_s16 }
   0x4   :  { %s180_s17 = smov 256   ;;  %s181_s18 = smov 16  }
   0x5   :  { %22 = dma.hbm_to_vmem [thread:$0]  %s15_s11, 1024, %s17_s13, [#allocation3], %s180_s17, %s180_s17, %s181_s18  }
   0x6   :  { %s182_s19 = smov [#allocation5]  }
   0x7   :  { %s29_s20 = sshll.u32 %s182_s19, 4  ;;  %s30_s20 = int_to_ptr.vmem [resolvable:$true] %s29_s20 }
   0x8   :  { %35 = dma.hbm_to_vmem [thread:$0]  %s28_s16, 1024, %s30_s20, [#allocation6], %s180_s17, %s180_s17, %s181_s18  }
   0x9   :  { %173 = dma.done.wait [#allocation3], 1024  }
   0xa   :  { %174 = vsyncadd [#allocation3], 4294966272 }
   0xb   :  { %175 = dma.done.wait [#allocation6], 1024  }
   0xc   :  { %176 = vsyncadd [#allocation6], 4294966272  ;;  %v44_v0 = vld [vmem:[#allocation2] sm:$0xff]  ;;  %v45_v2 = vld [vmem:[#allocation2 + $0x8] sm:$0xff]  ;;  %s183_s0 = smov [#allocation7]   ;;  %s82_s23 = sshll.u32 %s219_s2, 4  ;;  %s83_s23 = int_to_ptr.hbm [resolvable:$true] %s82_s23 }
   0xd   :  { %v52_v1 = vld [vmem:[#allocation5] sm:$0xff]  ;;  %v53_v4 = vld [vmem:[#allocation5 + $0x8] sm:$0xff]  ;;  %v46_v5 = vld [vmem:[#allocation2 + $0x10] sm:$0xff]  ;;  %s80_s1 = sshll.u32 %s183_s0, 4  ;;  %s81_s1 = int_to_ptr.vmem [resolvable:$true] %s80_s1 }
   0xe   :  { %v60_v3 = vadd.f32 %v52_v1, %v44_v0  ;;  %v54_v6 = vld [vmem:[#allocation5 + $0x10] sm:$0xff]  ;;  %v61_v7 = vadd.f32 %v53_v4, %v45_v2  ;;  %v47_v9 = vld [vmem:[#allocation2 + $0x18] sm:$0xff]  ;;  %v48_v11 = vld [vmem:[#allocation2 + $0x20] sm:$0xff] }
   0xf   :  { %v62_v8 = vadd.f32 %v54_v6, %v46_v5  ;;  %v55_v10 = vld [vmem:[#allocation5 + $0x18] sm:$0xff]  ;;  %v56_v13 = vld [vmem:[#allocation5 + $0x20] sm:$0xff]  ;;  %v49_v14 = vld [vmem:[#allocation2 + $0x28] sm:$0xff] }
  0x10   :  { %68 = vst [vmem:[#allocation7] sm:$0xff] %v60_v3  ;;  %v63_v12 = vadd.f32 %v55_v10, %v47_v9  ;;  %v57_v15 = vld [vmem:[#allocation5 + $0x28] sm:$0xff]  ;;  %v64_v16 = vadd.f32 %v56_v13, %v48_v11  ;;  %v50_v18 = vld [vmem:[#allocation2 + $0x30] sm:$0xff]  ;;  %v51_v20 = vld [vmem:[#allocation2 + $0x38] sm:$0xff] }
  0x11   :  { %69 = vst [vmem:[#allocation7 + $0x8] sm:$0xff] %v61_v7  ;;  %v65_v17 = vadd.f32 %v57_v15, %v49_v14  ;;  %v58_v19 = vld [vmem:[#allocation5 + $0x30] sm:$0xff]  ;;  %v59_v22 = vld [vmem:[#allocation5 + $0x38] sm:$0xff] }
  0x12   :  { %70 = vst [vmem:[#allocation7 + $0x10] sm:$0xff] %v62_v8  ;;  %v66_v21 = vadd.f32 %v58_v19, %v50_v18  ;;  %v67_v23 = vadd.f32 %v59_v22, %v51_v20 }
  0x13   :  { %71 = vst [vmem:[#allocation7 + $0x18] sm:$0xff] %v63_v12 }
  0x14   :  { %72 = vst [vmem:[#allocation7 + $0x20] sm:$0xff] %v64_v16 }
  0x15   :  { %73 = vst [vmem:[#allocation7 + $0x28] sm:$0xff] %v65_v17 }
  0x16   :  { %74 = vst [vmem:[#allocation7 + $0x30] sm:$0xff] %v66_v21 }
  0x17   :  { %75 = vst [vmem:[#allocation7 + $0x38] sm:$0xff] %v67_v23 }
  0x18   :  { %88 = dma.vmem_to_hbm [thread:$0]  %s81_s1, 1024, %s83_s23, [#allocation4], %s180_s17, %s180_s17, %s181_s18  }
  0x19   :  { %177 = dma.done.wait [#allocation4], 1024  }
  0x1a   :  { %178 = vsyncadd [#allocation4], 4294966272 }
  0x1b   :  { %93 = vsyncpa [#allocation3], 1 }
  0x1c   :  { %94 = vsyncpa [#allocation6], 1 }
  0x1d   :  { %95 = vsyncpa [#allocation4], 1 }

</bundles_post_ra>
